<compile_context>
chip_gen: v5e
topology: v5e:2x2
jax: 0.10.0
libtpu: 0.0.40
codegen_flags: <defaults>
</compile_context>

<pallas_src>
import functools

import jax
import jax.numpy as jnp
from jax import lax
from jax.experimental import pallas as pl
from jax.experimental.pallas import tpu as pltpu


# ----------------------------------------------------------------- lane-aligned constants
VOCAB = 256
EMBED_DIM = 128
VISION_WIDTH = 128
TEXT_WIDTH = 128
QUEUE_SIZE = 126            # B + QUEUE_SIZE == 128 for B=2 -> lane-dense similarity rows
PATCH = 8
TEMP = 0.07
MOMENTUM = 0.9
MLM_PROB = 0.15
MASK_TOKEN = VOCAB - 1

_VMEM_LIMIT = 32 * 1024 * 1024   # safe on v5e (128M phys), v6e (128M), v7x (64M)


def _pick_tile(m, cap=256):
    for t in (cap, 128, 64, 32, 16, 8):
        if t <= cap and m % t == 0:
            return t
    return m   # fall back to a full-extent block (always legal)


# -------------------------------------------------------------------------- tiled linear

def _linear_kernel(x_ref, w_ref, b_ref, o_ref, *, act):
    y = jnp.dot(x_ref[...], w_ref[...], preferred_element_type=jnp.float32) + b_ref[...]
    if act == "gelu":
        y = jax.nn.gelu(y)
    o_ref[...] = y.astype(o_ref.dtype)


def pallas_linear_stacked(x, w, b, act=None, tm=256):
    """x: (S, M, K) bf16, w: (S, K, N) bf16, b: (S, 1, N) f32 -> (S, M, N) bf16.

    One launch for S weight sets (main + momentum), gridded over row tiles; both grid
    axes are 'parallel' so v7x can shard them across its two TensorCores.
    """
    S, M, K = x.shape
    N = w.shape[-1]
    tm = _pick_tile(M, tm)
    return pl.pallas_call(
        functools.partial(_linear_kernel, act=act),
        out_shape=jax.ShapeDtypeStruct((S, M, N), jnp.bfloat16),
        grid=(S, M // tm),
        in_specs=[
            pl.BlockSpec((None, tm, K), lambda s, i: (s, i, 0)),
            pl.BlockSpec((None, K, N), lambda s, i: (s, 0, 0)),
            pl.BlockSpec((None, 1, N), lambda s, i: (s, 0, 0)),
        ],
        out_specs=pl.BlockSpec((None, tm, N), lambda s, i: (s, i, 0)),
        compiler_params=pltpu.CompilerParams(
            dimension_semantics=("parallel", "parallel"),
            vmem_limit_bytes=_VMEM_LIMIT),
    )(x, w, b)


# ----------------------------------------------------------------- cross-attention fusion

def _fusion_kernel(txt_ref, img_ref, wq_ref, wkv_ref, wo_ref, o_ref):
    # one (text-queries) x (image keys/values) cross-attention block per grid point
    t = txt_ref[...]                          # (L, D)  bf16
    im = img_ref[...]                         # (N, Dv) bf16
    D = t.shape[-1]
    q = jnp.dot(t, wq_ref[...], preferred_element_type=jnp.float32)       # (L, D)
    kv = jnp.dot(im, wkv_ref[...], preferred_element_type=jnp.float32)    # (N, 2D) k|v folded
    k = kv[:, :D]
    v = kv[:, D:]
    s = lax.dot_general(q, k, (((1,), (1,)), ((), ())),
                        preferred_element_type=jnp.float32) * (1.0 / (D ** 0.5))
    a = jax.nn.softmax(s, axis=-1)                                        # f32 elementwise
    ctx = jnp.dot(a.astype(jnp.bfloat16), v.astype(jnp.bfloat16),
                  preferred_element_type=jnp.float32)
    out = jnp.dot(ctx.astype(jnp.bfloat16), wo_ref[...],
                  preferred_element_type=jnp.float32)
    o_ref[...] = (t.astype(jnp.float32) + out).astype(o_ref.dtype)        # residual


def pallas_fusion(txt, img, wq, wkv, wo):
    """txt: (S, B, L, D), img: (S, B, N, Dv), weights (S, ., .) -> (S, B, L, D) bf16."""
    S, B, L, D = txt.shape
    N, Dv = img.shape[2], img.shape[3]
    # TODO(synk): for production N (e.g. 577 patches) tile the key/value axis with an
    # online-softmax accumulator instead of holding the full (L, N) score block.
    return pl.pallas_call(
        _fusion_kernel,
        out_shape=jax.ShapeDtypeStruct((S, B, L, D), jnp.bfloat16),
        grid=(S, B),
        in_specs=[
            pl.BlockSpec((None, None, L, D), lambda s, b: (s, b, 0, 0)),
            pl.BlockSpec((None, None, N, Dv), lambda s, b: (s, b, 0, 0)),
            pl.BlockSpec((None, D, D), lambda s, b: (s, 0, 0)),
            pl.BlockSpec((None, Dv, 2 * D), lambda s, b: (s, 0, 0)),
            pl.BlockSpec((None, D, D), lambda s, b: (s, 0, 0)),
        ],
        out_specs=pl.BlockSpec((None, None, L, D), lambda s, b: (s, b, 0, 0)),
        compiler_params=pltpu.CompilerParams(
            dimension_semantics=("parallel", "parallel"),
            vmem_limit_bytes=_VMEM_LIMIT),
    )(txt, img, wq, wkv, wo)


# ---------------------------------------------------- fused proj + normalize + ITA loss

def _ita_kernel(img_cls_ref, img_cls_m_ref, txt_cls_ref, txt_cls_m_ref,
                vw_ref, vb_ref, vwm_ref, vbm_ref,
                tw_ref, tb_ref, twm_ref, tbm_ref,
                iq_ref, tq_ref, temp_ref,
                loss_ref, si2t_ref, st2i_ref, ifm_ref, tfm_ref, *, alpha):
    inv_temp = 1.0 / temp_ref[0]

    def proj_norm(x, w, b):                                   # F.normalize(linear(x))
        y = jnp.dot(x, w, preferred_element_type=jnp.float32) + b
        inv = lax.rsqrt(jnp.maximum(jnp.sum(y * y, axis=-1, keepdims=True), 1e-24))
        return y * inv

    img_f = proj_norm(img_cls_ref[...], vw_ref[...], vb_ref[...])
    img_fm = proj_norm(img_cls_m_ref[...], vwm_ref[...], vbm_ref[...])
    txt_f = proj_norm(txt_cls_ref[...], tw_ref[...], tb_ref[...])
    txt_fm = proj_norm(txt_cls_m_ref[...], twm_ref[...], tbm_ref[...])

    B = img_f.shape[0]
    eye = (lax.broadcasted_iota(jnp.int32, (B, B), 0)
           == lax.broadcasted_iota(jnp.int32, (B, B), 1)).astype(jnp.float32)

    def sided_loss(feat, feat_m_self, feat_m_other, queue):
        # similarities against [feat_m_other.T | queue] kept as two parts -> no
        # unaligned in-kernel concatenation; joint softmax via a shared max / lse.
        s1 = jnp.einsum("be,ce->bc", feat, feat_m_other,
                        preferred_element_type=jnp.float32) * inv_temp          # (B, B)
        s2 = jnp.dot(feat, queue, preferred_element_type=jnp.float32) * inv_temp  # (B, Q)
        m1 = jnp.einsum("be,ce->bc", feat_m_self, feat_m_other,
                        preferred_element_type=jnp.float32) * inv_temp
        m2 = jnp.dot(feat_m_self, queue, preferred_element_type=jnp.float32) * inv_temp

        # soft targets = alpha * softmax([m1|m2]) + (1-alpha) * [eye|0]
        mm = jnp.maximum(jnp.max(m1, axis=-1, keepdims=True),
                         jnp.max(m2, axis=-1, keepdims=True))
        e1 = jnp.exp(m1 - mm)
        e2 = jnp.exp(m2 - mm)
        zinv = 1.0 / (jnp.sum(e1, axis=-1, keepdims=True)
                      + jnp.sum(e2, axis=-1, keepdims=True))
        t1 = alpha * (e1 * zinv) + (1.0 - alpha) * eye
        t2 = alpha * (e2 * zinv)

        # cross-entropy with log_softmax over the joint [s1|s2] row
        ms = jnp.maximum(jnp.max(s1, axis=-1, keepdims=True),
                         jnp.max(s2, axis=-1, keepdims=True))
        lse = ms + jnp.log(jnp.sum(jnp.exp(s1 - ms), axis=-1, keepdims=True)
                           + jnp.sum(jnp.exp(s2 - ms), axis=-1, keepdims=True))
        loss = -jnp.mean(jnp.sum((s1 - lse) * t1, axis=-1)
                         + jnp.sum((s2 - lse) * t2, axis=-1))
        return loss, s1

    loss_i2t, s_i2t = sided_loss(img_f, img_fm, txt_fm, tq_ref[...])
    loss_t2i, s_t2i = sided_loss(txt_f, txt_fm, img_fm, iq_ref[...])

    loss_ref[0, 0] = 0.5 * (loss_i2t + loss_t2i)
    si2t_ref[...] = s_i2t            # == sim_i2t[:, :B]; used for hard-negative mining
    st2i_ref[...] = s_t2i
    ifm_ref[...] = img_fm
    tfm_ref[...] = txt_fm


def pallas_ita_loss(img_cls, img_cls_m, txt_cls, txt_cls_m, p, p_m, iq, tq, temp, alpha):
    B = img_cls.shape[0]
    E = p["vision_proj_w"].shape[1]
    vmem = pl.BlockSpec(memory_space=pltpu.MemorySpace.VMEM)
    smem = pl.BlockSpec(memory_space=pltpu.MemorySpace.SMEM)
    return pl.pallas_call(
        functools.partial(_ita_kernel, alpha=float(alpha)),
        out_shape=(jax.ShapeDtypeStruct((1, 1), jnp.float32),
                   jax.ShapeDtypeStruct((B, B), jnp.float32),
                   jax.ShapeDtypeStruct((B, B), jnp.float32),
                   jax.ShapeDtypeStruct((B, E), jnp.float32),
                   jax.ShapeDtypeStruct((B, E), jnp.float32)),
        in_specs=[vmem] * 14 + [smem],
        compiler_params=pltpu.CompilerParams(vmem_limit_bytes=_VMEM_LIMIT),
    )(img_cls, img_cls_m, txt_cls, txt_cls_m,
      p["vision_proj_w"], p["vision_proj_b"].reshape(1, -1),
      p_m["vision_proj_w"], p_m["vision_proj_b"].reshape(1, -1),
      p["text_proj_w"], p["text_proj_b"].reshape(1, -1),
      p_m["text_proj_w"], p_m["text_proj_b"].reshape(1, -1),
      iq, tq, jnp.reshape(temp, (1,)).astype(jnp.float32))


# --------------------------------------------------------------------------- ITM loss

def _itm_kernel(x_ref, w_ref, b_ref, loss_ref, *, bs):
    logits = jnp.dot(x_ref[...], w_ref[...], preferred_element_type=jnp.float32) + b_ref[...]
    mx = jnp.max(logits, axis=-1, keepdims=True)
    lse = mx + jnp.log(jnp.sum(jnp.exp(logits - mx), axis=-1, keepdims=True))      # (M, 1)
    row = lax.broadcasted_iota(jnp.int32, (logits.shape[0], 1), 0)
    label = (row < bs).astype(jnp.int32)                # first bs rows are positives
    cls = lax.broadcasted_iota(jnp.int32, logits.shape, 1)
    lab_logit = jnp.sum(jnp.where(cls == label, logits, 0.0), axis=-1, keepdims=True)
    loss_ref[0, 0] = jnp.mean(lse - lab_logit)          # nll = logsumexp - gathered logit


def pallas_itm_loss(vl, w, b, bs):
    return pl.pallas_call(
        functools.partial(_itm_kernel, bs=bs),
        out_shape=jax.ShapeDtypeStruct((1, 1), jnp.float32),
        compiler_params=pltpu.CompilerParams(vmem_limit_bytes=_VMEM_LIMIT),
    )(vl, w, b.reshape(1, -1).astype(jnp.float32))


# --------------------------------------------------- fused MLM head + CE + distillation

def _mlm_loss_kernel(h_ref, hm_ref, w_ref, b_ref, wm_ref, bm_ref, lab_ref,
                     loss_ref, acc_ref, *, alpha):
    i = pl.program_id(0)

    @pl.when(i == 0)
    def _():
        acc_ref[0] = 0.0
        acc_ref[1] = 0.0

    # MLM head matmul + loss fused per row tile: the (tm, V) logits never leave VMEM.
    logits = jnp.dot(h_ref[...], w_ref[...], preferred_element_type=jnp.float32) + b_ref[...]
    logits_m = jnp.dot(hm_ref[...], wm_ref[...], preferred_element_type=jnp.float32) + bm_ref[...]

    mx = jnp.max(logits, axis=-1, keepdims=True)
    lse = mx + jnp.log(jnp.sum(jnp.exp(logits - mx), axis=-1, keepdims=True))      # (tm, 1)

    lab = lab_ref[...]                                                             # (tm, 1)
    cls = lax.broadcasted_iota(jnp.int32, logits.shape, 1)
    lab_logit = jnp.sum(jnp.where(cls == lab, logits, 0.0), axis=-1, keepdims=True)
    nll = lse - lab_logit                                          # hard-label CE

    soft = jax.nn.softmax(logits_m, axis=-1)                       # momentum soft labels
    distill = lse - jnp.sum(soft * logits, axis=-1, keepdims=True) # -sum(soft*log_softmax)

    valid = (lab >= 0).astype(jnp.float32)                         # labels == -100 ignored
    per_tok = (1.0 - alpha) * nll + alpha * distill
    acc_ref[0] += jnp.sum(per_tok * valid)
    acc_ref[1] += jnp.sum(valid)

    @pl.when(i == pl.num_programs(0) - 1)
    def _():
        loss_ref[0, 0] = acc_ref[0] / jnp.maximum(acc_ref[1], 1.0)


def pallas_mlm_loss(h, h_m, w, b, w_m, b_m, labels, alpha, tm=256):
    M, D = h.shape
    V = w.shape[1]
    tm = _pick_tile(M, tm)
    return pl.pallas_call(
        functools.partial(_mlm_loss_kernel, alpha=float(alpha)),
        out_shape=jax.ShapeDtypeStruct((1, 1), jnp.float32),
        grid=(M // tm,),
        in_specs=[
            pl.BlockSpec((tm, D), lambda i: (i, 0)),
            pl.BlockSpec((tm, D), lambda i: (i, 0)),
            pl.BlockSpec((D, V), lambda i: (0, 0)),
            pl.BlockSpec((1, V), lambda i: (0, 0)),
            pl.BlockSpec((D, V), lambda i: (0, 0)),
            pl.BlockSpec((1, V), lambda i: (0, 0)),
            pl.BlockSpec((tm, 1), lambda i: (i, 0)),
        ],
        out_specs=pl.BlockSpec((1, 1), lambda i: (0, 0)),
        scratch_shapes=[pltpu.SMEM((2,), jnp.float32)],
        compiler_params=pltpu.CompilerParams(
            dimension_semantics=("arbitrary",),
            vmem_limit_bytes=_VMEM_LIMIT),
    )(h, h_m, w, b.reshape(1, V).astype(jnp.float32),
      w_m, b_m.reshape(1, V).astype(jnp.float32),
      labels.reshape(M, 1).astype(jnp.int32))


# ------------------------------------------------------------------- synthetic encoders

def patchify(image, patch=PATCH):
    """NCHW image -> (B*N_patches, C*patch*patch) rows (plain-JAX layout glue)."""
    B, C, H, W = image.shape
    nh, nw = H // patch, W // patch
    x = image.reshape(B, C, nh, patch, nw, patch)
    x = jnp.transpose(x, (0, 2, 4, 1, 3, 5)).reshape(B * nh * nw, C * patch * patch)
    return x.astype(jnp.bfloat16), nh * nw


def dual_image_encode(p, p_m, image):
    """Main + momentum patch embeddings in ONE launch (weights folded along N)."""
    patches, n_patches = patchify(image)
    B = image.shape[0]
    w_cat = jnp.concatenate([p["patch_w"], p_m["patch_w"]], axis=1)         # (K, 2*Vw)
    b_cat = jnp.concatenate([p["patch_b"], p_m["patch_b"]], axis=0).reshape(1, 1, -1)
    emb = pallas_linear_stacked(patches[None], w_cat[None], b_cat)[0]       # (B*N, 2*Vw)
    img = emb[:, :VISION_WIDTH].reshape(B, n_patches, VISION_WIDTH)
    img_m = lax.stop_gradient(emb[:, VISION_WIDTH:]).reshape(B, n_patches, VISION_WIDTH)
    return img, img_m


def dual_text_encode(p, p_m, ids):
    """Main + momentum text encoders in ONE launch (stacked weight-set axis)."""
    B, L = ids.shape
    emb = jnp.take(p["tok_emb"], ids, axis=0).reshape(B * L, TEXT_WIDTH)
    emb_m = jnp.take(p_m["tok_emb"], ids, axis=0).reshape(B * L, TEXT_WIDTH)
    x = jnp.stack([emb, emb_m], axis=0)
    w = jnp.stack([p["txt_w"], p_m["txt_w"]], axis=0)
    b = jnp.stack([p["txt_b"].reshape(1, -1), p_m["txt_b"].reshape(1, -1)], axis=0)
    h = pallas_linear_stacked(x, w, b, act="gelu")                          # (2, B*L, Tw)
    return (h[0].reshape(B, L, TEXT_WIDTH),
            lax.stop_gradient(h[1]).reshape(B, L, TEXT_WIDTH))


# ----------------------------------------------------------------------------- ALBEF

def init_params(key):
    ks = jax.random.split(key, 16)
    n = lambda k, s: (0.02 * jax.random.normal(k, s)).astype(jnp.bfloat16)
    zf = lambda s: jnp.zeros(s, jnp.float32)
    p = {
        "patch_w": n(ks[0], (3 * PATCH * PATCH, VISION_WIDTH)),
        "patch_b": zf((VISION_WIDTH,)),
        "tok_emb": n(ks[1], (VOCAB, TEXT_WIDTH)),
        "txt_w": n(ks[2], (TEXT_WIDTH, TEXT_WIDTH)),
        "txt_b": zf((TEXT_WIDTH,)),
        "wq": n(ks[3], (TEXT_WIDTH, TEXT_WIDTH)),
        "wk": n(ks[4], (VISION_WIDTH, TEXT_WIDTH)),
        "wv": n(ks[5], (VISION_WIDTH, TEXT_WIDTH)),
        "wo": n(ks[6], (TEXT_WIDTH, TEXT_WIDTH)),
        "mlm_w": n(ks[7], (TEXT_WIDTH, VOCAB)),
        "mlm_b": zf((VOCAB,)),
        "vision_proj_w": n(ks[8], (VISION_WIDTH, EMBED_DIM)),
        "vision_proj_b": zf((EMBED_DIM,)),
        "text_proj_w": n(ks[9], (TEXT_WIDTH, EMBED_DIM)),
        "text_proj_b": zf((EMBED_DIM,)),
        "itm_w": n(ks[10], (TEXT_WIDTH, 2)),
        "itm_b": zf((2,)),
        "temp": jnp.float32(TEMP),
    }
    mom_keys = ["patch_w", "patch_b", "tok_emb", "txt_w", "txt_b",
                "wq", "wk", "wv", "wo", "mlm_w", "mlm_b",
                "vision_proj_w", "vision_proj_b", "text_proj_w", "text_proj_b"]
    p_m = {k: p[k] for k in mom_keys}
    iq = jax.random.normal(ks[11], (EMBED_DIM, QUEUE_SIZE)).astype(jnp.float32)
    tq = jax.random.normal(ks[12], (EMBED_DIM, QUEUE_SIZE)).astype(jnp.float32)
    iq = iq / jnp.maximum(jnp.linalg.norm(iq, axis=0, keepdims=True), 1e-12)
    tq = tq / jnp.maximum(jnp.linalg.norm(tq, axis=0, keepdims=True), 1e-12)
    state = {"image_queue": iq, "text_queue": tq,
             "queue_ptr": jnp.zeros((1,), jnp.int32)}
    return p, p_m, state


def momentum_update(p, p_m, m=MOMENTUM):
    return {k: (p_m[k] * m + p[k] * (1.0 - m)).astype(p_m[k].dtype) for k in p_m}


def albef_forward(params, params_m, state, image, input_ids, attention_mask,
                  alpha=0.4, rng=None):
    B = image.shape[0]
    L = input_ids.shape[1]
    temp = jnp.clip(params["temp"], 0.001, 0.5)

    # ---- momentum update (torch.no_grad)
    # TODO(synk): forward-only; wrap momentum branch in custom_vjp if ever differentiated.
    params_m = jax.tree_util.tree_map(lax.stop_gradient, momentum_update(params, params_m))

    # ---- unimodal encoders: main + momentum batched into single launches
    image_embeds, image_embeds_m = dual_image_encode(params, params_m, image)
    text_embeds, text_embeds_m = dual_text_encode(params, params_m, input_ids)

    # ---- ITA: projections + L2-norm + similarities + soft targets + loss in ONE kernel
    ita_loss, sim_i2t_bb, sim_t2i_bb, image_feat_m, text_feat_m = pallas_ita_loss(
        image_embeds[:, 0, :], image_embeds_m[:, 0, :],
        text_embeds[:, 0, :], text_embeds_m[:, 0, :],
        params, params_m, state["image_queue"], state["text_queue"], temp, alpha)
    loss_ita = ita_loss[0, 0]

    # ---- dequeue & enqueue (world_size == 1, concat_all_gather is identity)
    # TODO(synk): concat_all_gather across devices not implemented (single-device queue).
    assert QUEUE_SIZE % B == 0
    ptr = state["queue_ptr"][0]
    iq = lax.dynamic_update_slice(state["image_queue"], image_feat_m.T, (0, ptr))
    tq = lax.dynamic_update_slice(state["text_queue"], text_feat_m.T, (0, ptr))
    new_state = {"image_queue": iq, "text_queue": tq,
                 "queue_ptr": jnp.array([(ptr + B) % QUEUE_SIZE], jnp.int32)}

    # ---- ITM: hard negatives, then positives + both negative pairings in ONE fusion call
    # TODO(synk): torch.multinomial sampling replaced by deterministic argmax.
    eye = jnp.eye(B, dtype=jnp.float32)
    weights_i2t = jax.nn.softmax(sim_i2t_bb, axis=1) * (1.0 - eye)
    weights_t2i = jax.nn.softmax(sim_t2i_bb, axis=1) * (1.0 - eye)
    neg_img_idx = jnp.argmax(weights_t2i, axis=1)
    neg_txt_idx = jnp.argmax(weights_i2t, axis=1)
    image_embeds_neg = jnp.take(image_embeds, neg_img_idx, axis=0)
    text_embeds_neg = jnp.take(text_embeds, neg_txt_idx, axis=0)

    wkv = jnp.concatenate([params["wk"], params["wv"]], axis=1)        # lane-dense k|v slab
    txt_itm = jnp.concatenate([text_embeds, text_embeds, text_embeds_neg], axis=0)[None]
    img_itm = jnp.concatenate([image_embeds, image_embeds_neg, image_embeds], axis=0)[None]
    fused_itm = pallas_fusion(txt_itm, img_itm,
                              params["wq"][None], wkv[None], params["wo"][None])[0]
    vl_embeddings = fused_itm[:, 0, :]                                 # (3B, D) CLS tokens
    loss_itm = pallas_itm_loss(vl_embeddings, params["itm_w"], params["itm_b"], bs=B)[0, 0]

    # ---- MLM with momentum distillation
    # TODO(synk): simplified BERT-style masking (no 80/10/10 split, no special-token skip).
    mkey = rng if rng is not None else jax.random.PRNGKey(1)
    mlm_mask = jax.random.bernoulli(mkey, MLM_PROB, input_ids.shape)
    labels = jnp.where(mlm_mask, input_ids, -100).astype(jnp.int32)
    masked_ids = jnp.where(mlm_mask, MASK_TOKEN, input_ids).astype(jnp.int32)

    h_masked, h_masked_m = dual_text_encode(params, params_m, masked_ids)
    wkv_m = jnp.concatenate([params_m["wk"], params_m["wv"]], axis=1)
    fused = pallas_fusion(                                             # main + momentum fused
        jnp.stack([h_masked, h_masked_m], axis=0),
        jnp.stack([image_embeds, image_embeds_m], axis=0),
        jnp.stack([params["wq"], params_m["wq"]], axis=0),
        jnp.stack([wkv, wkv_m], axis=0),
        jnp.stack([params["wo"], params_m["wo"]], axis=0))             # (2, B, L, D)

    # MLM head + CE + distillation fused; (B*L, V) logits never hit HBM.
    loss_mlm = pallas_mlm_loss(
        fused[0].reshape(B * L, TEXT_WIDTH),
        lax.stop_gradient(fused[1]).reshape(B * L, TEXT_WIDTH),
        params["mlm_w"], params["mlm_b"],
        params_m["mlm_w"], params_m["mlm_b"],
        labels.reshape(-1), alpha,
        tm=8)  # small demo shapes; use 256-512 row tiles at production sizes
    loss_mlm = loss_mlm[0, 0]

    return (loss_mlm, loss_ita, loss_itm), params_m, new_state


# ----------------------------------------------------------------------------- main

if __name__ == "__main__":
    key = jax.random.PRNGKey(0)
    pkey, ikey, tkey, mkey = jax.random.split(key, 4)

    params, params_m, state = init_params(pkey)

    B, L = 2, 8
    image = jax.random.normal(ikey, (B, 3, 16, 16), dtype=jnp.float32)       # NCHW
    input_ids = jax.random.randint(tkey, (B, L), 0, VOCAB - 1).astype(jnp.int32)
    attention_mask = jnp.ones((B, L), jnp.int32)

    (loss_mlm, loss_ita, loss_itm), _, _ = albef_forward(
        params, params_m, state, image, input_ids, attention_mask, alpha=0.4, rng=mkey)

    jax.block_until_ready((loss_mlm, loss_ita, loss_itm))
    for name, v in [("loss_mlm", loss_mlm), ("loss_ita", loss_ita), ("loss_itm", loss_itm)]:
        assert jnp.isfinite(v), name
    print("KERNEL_OK")
</pallas_src>

<mosaic_0001>
module attributes {stable_mosaic.version = 11 : i64} {
  func.func @_linear_kernel(%arg0: i32, %arg1: i32, %arg2: memref<1x8x192xbf16, #tpu.memory_space<vmem>>, %arg3: memref<1x192x256xbf16, #tpu.memory_space<vmem>>, %arg4: memref<1x1x256xf32, #tpu.memory_space<vmem>>, %arg5: memref<1x8x256xbf16, #tpu.memory_space<vmem>>) attributes {dimension_semantics = [#tpu.dimension_semantics<parallel>, #tpu.dimension_semantics<parallel>], iteration_bounds = array<i64: 1, 1>, scalar_prefetch = 0 : i64, scratch_operands = 0 : i64, tpu.core_type = #tpu.core_type<tc>, window_params = [{transform_indices = @transform_0, window_bounds = array<i64: 1, 8, 192>}, {transform_indices = @transform_1, window_bounds = array<i64: 1, 192, 256>}, {transform_indices = @transform_2, window_bounds = array<i64: 1, 1, 256>}, {transform_indices = @transform_3, window_bounds = array<i64: 1, 8, 256>}]} {
    %c0 = arith.constant 0 : index
    %c0_0 = arith.constant 0 : index
    %c0_1 = arith.constant 0 : index
    %0 = vector.load %arg2[%c0, %c0_0, %c0_1] : memref<1x8x192xbf16, #tpu.memory_space<vmem>>, vector<1x8x192xbf16>
    %1 = vector.shape_cast %0 : vector<1x8x192xbf16> to vector<8x192xbf16>
    %c0_2 = arith.constant 0 : index
    %c0_3 = arith.constant 0 : index
    %c0_4 = arith.constant 0 : index
    %2 = vector.load %arg3[%c0_2, %c0_3, %c0_4] : memref<1x192x256xbf16, #tpu.memory_space<vmem>>, vector<1x192x256xbf16>
    %3 = vector.shape_cast %2 : vector<1x192x256xbf16> to vector<192x256xbf16>
    %cst = arith.constant dense<0.000000e+00> : vector<8x256xf32>
    %4 = tpu.matmul %1, %3, %cst {dimension_numbers = #tpu.dot_dimension_numbers<[1], [0], [0], [1], [0, 0, 1, 1], [], []>} : vector<8x192xbf16>, vector<192x256xbf16>, vector<8x256xf32> -> vector<8x256xf32>
    %c0_5 = arith.constant 0 : index
    %c0_6 = arith.constant 0 : index
    %c0_7 = arith.constant 0 : index
    %5 = vector.load %arg4[%c0_5, %c0_6, %c0_7] : memref<1x1x256xf32, #tpu.memory_space<vmem>>, vector<1x1x256xf32>
    %6 = vector.shape_cast %5 : vector<1x1x256xf32> to vector<1x256xf32>
    %7 = vector.broadcast %6 : vector<1x256xf32> to vector<8x256xf32>
    %8 = arith.addf %4, %7 : vector<8x256xf32>
    %9 = arith.truncf %8 : vector<8x256xf32> to vector<8x256xbf16>
    %c0_8 = arith.constant 0 : index
    %c0_9 = arith.constant 0 : index
    %c0_10 = arith.constant 0 : index
    %10 = vector.load %arg5[%c0_8, %c0_9, %c0_10] : memref<1x8x256xbf16, #tpu.memory_space<vmem>>, vector<1x8x256xbf16>
    %11 = vector.shape_cast %10 : vector<1x8x256xbf16> to vector<8x256xbf16>
    %12 = vector.shape_cast %9 : vector<8x256xbf16> to vector<1x8x256xbf16>
    tpu.vector_store %arg5[%c0_8, %c0_9, %c0_10], %12 {strides = array<i32>} : memref<1x8x256xbf16, #tpu.memory_space<vmem>>, vector<1x8x256xbf16>,
    return
  }
  func.func @transform_0(%arg0: i32, %arg1: i32) -> (i32, i32, i32) {
    %c0_i32 = arith.constant 0 : i32
    %c0_i32_0 = arith.constant 0 : i32
    return %arg0, %arg1, %c0_i32 : i32, i32, i32
  }
  func.func @transform_1(%arg0: i32, %arg1: i32) -> (i32, i32, i32) {
    %c0_i32 = arith.constant 0 : i32
    %c0_i32_0 = arith.constant 0 : i32
    %c0_i32_1 = arith.constant 0 : i32
    return %arg0, %c0_i32, %c0_i32_0 : i32, i32, i32
  }
  func.func @transform_2(%arg0: i32, %arg1: i32) -> (i32, i32, i32) {
    %c0_i32 = arith.constant 0 : i32
    %c0_i32_0 = arith.constant 0 : i32
    %c0_i32_1 = arith.constant 0 : i32
    return %arg0, %c0_i32, %c0_i32_0 : i32, i32, i32
  }
  func.func @transform_3(%arg0: i32, %arg1: i32) -> (i32, i32, i32) {
    %c0_i32 = arith.constant 0 : i32
    %c0_i32_0 = arith.constant 0 : i32
    return %arg0, %arg1, %c0_i32 : i32, i32, i32
  }
}

</mosaic_0001>

<bundles_post_ra>
// kernel: tpu_custom_call.1
= control target key start
LH: loop header
LB: loop body
LE: loop exit
PB: predicated region body
PF: predicated region fallthrough
CT: control target
= control target key end

     0   :  { %8 = vsyncpa [#allocation3], 0  ;;  %s562_s0 = inlined_call_operand.hbm [shape: bf16[1,8,192], index: 0, kind: input, shape index: {}]   ;;  %s563_s1 = inlined_call_operand.hbm [shape: bf16[1,192,256], index: 1, kind: input, shape index: {}]   ;;  %s564_s2 = inlined_call_operand.hbm [shape: f32[1,1,256], index: 2, kind: input, shape index: {}]   ;;  %s565_s3 = inlined_call_operand.hbm [shape: bf16[1,8,256], index: 3, kind: output, shape index: {}]  }
   0x1   :  { %9 = vsyncpa [#allocation6], 0  ;;  %s26_s14 = sshll.u32 %s563_s1, 4  ;;  %s27_s14 = int_to_ptr.hbm [resolvable:$true] %s26_s14 }
   0x2   :  { %10 = vsyncpa [#allocation4], 0  ;;  %s522_s15 = smov [#allocation5]   ;;  %s16_s19 = sshll.u32 %s562_s0, 4  ;;  %s17_s19 = int_to_ptr.hbm [resolvable:$true] %s16_s19 }
   0x3   :  { %s28_s16 = sshll.u32 %s522_s15, 4  ;;  %s523_s20 = smov 128   ;;  %s29_s16 = int_to_ptr.vmem [resolvable:$true] %s28_s16 }
   0x4   :  { %s524_s21 = smov 8   ;;  %s525_s22 = smov [#allocation2]  }
   0x5   :  { %34 = dma.hbm_to_vmem [thread:$0]  %s27_s14, 3072, %s29_s16, [#allocation6], %s523_s20, %s523_s20, %s524_s21  }
   0x6   :  { %s18_s23 = sshll.u32 %s525_s22, 4  ;;  %s40_s26 = sshll.u32 %s564_s2, 4  ;;  %s19_s23 = int_to_ptr.vmem [resolvable:$true] %s18_s23  ;;  %s41_s26 = int_to_ptr.hbm [resolvable:$true] %s40_s26 }
   0x7   :  { %21 = dma.hbm_to_vmem [thread:$0]  %s17_s19, 128, %s19_s23, [#allocation3]  }
   0x8   :  { %s526_s1 = smov [#allocation7]  }
   0x9   :  { %s42_s27 = sshll.u32 %s526_s1, 4  ;;  %s43_s27 = int_to_ptr.vmem [resolvable:$true] %s42_s27 }
   0xa   :  { %45 = dma.hbm_to_vmem [thread:$0]  %s41_s26, 32, %s43_s27, [#allocation6]  }
   0xb   :  { %516 = dma.done.wait [#allocation3], 128  }
   0xc   :  { %517 = vsyncadd [#allocation3], 4294967168 }
   0xd   :  { %518 = dma.done.wait [#allocation6], 3104  }
   0xe   :  { %519 = vsyncadd [#allocation6], 4294964192  ;;  %v350_v0 = vld [vmem:[#allocation5 + $0x70] sm:$0xf]  ;;  %v405_v1 = vld [vmem:[#allocation5 + $0x74] sm:$0xf0] }
   0xf   :  { %v404_v2 = vld [vmem:[#allocation5 + $0x74] sm:$0xf]  ;;  %v351_v3 = vor.u32 %v405_v1, %v350_v0  ;;  %v352_v4 = vld [vmem:[#allocation5 + $0x78] sm:$0xf0]  ;;  %v342_v5 = vld [vmem:[#allocation5 + $0x60] sm:$0xf] }
  0x10   :  { %v403_v6 = vld [vmem:[#allocation5 + $0x64] sm:$0xf0]  ;;  %v355_v7 = vor.u32 %v404_v2, %v352_v4  ;;  %v402_v8 = vld [vmem:[#allocation5 + $0x64] sm:$0xf]  ;;  %v344_v9 = vld [vmem:[#allocation5 + $0x68] sm:$0xf0] }
  0x11   :  { %220 = vmatpush.bf16.msra.mxu0 %v351_v3  ;;  %v343_v10 = vor.u32 %v403_v6, %v342_v5  ;;  %v334_v11 = vld [vmem:[#allocation5 + $0x50] sm:$0xf]  ;;  %v347_v12 = vor.u32 %v402_v8, %v344_v9  ;;  %v401_v13 = vld [vmem:[#allocation5 + $0x54] sm:$0xf0]  ;;  %v412_v14 = vld [vmem:[#allocation5 + $0xb4] sm:$0xf] }
  0x12   :  { %246 = vmatpush.bf16.msra.mxu2 %v355_v7  ;;  %v384_v15 = vld [vmem:[#allocation5 + $0xb8] sm:$0xf0]  ;;  %v400_v16 = vld [vmem:[#allocation5 + $0x54] sm:$0xf]  ;;  %v410_v19 = vld [vmem:[#allocation5 + $0xa4] sm:$0xf]  ;;  %v335_v22 = vor.u32 %v401_v13, %v334_v11 }
  0x13   :  { %v336_v17 = vld [vmem:[#allocation5 + $0x58] sm:$0xf0]  ;;  %v387_v18 = vor.u32 %v412_v14, %v384_v15  ;;  %v376_v20 = vld [vmem:[#allocation5 + $0xa8] sm:$0xf0]  ;;  %v382_v21 = vld [vmem:[#allocation5 + $0xb0] sm:$0xf] }
  0x14   :  { %v326_v23 = vld [vmem:[#allocation5 + $0x40] sm:$0xf]  ;;  %v399_v24 = vld [vmem:[#allocation5 + $0x44] sm:$0xf0]  ;;  %v379_v25 = vor.u32 %v410_v19, %v376_v20  ;;  %v413_v26 = vld [vmem:[#allocation5 + $0xb4] sm:$0xf0]  ;;  %v339_v27 = vor.u32 %v400_v16, %v336_v17 }
  0x15   :  { %221 = vmatpush.bf16.msra.mxu0 %v343_v10  ;;  %263 = vmatpush.bf16.msra.mxu3 %v387_v18  ;;  %v398_v28 = vld [vmem:[#allocation5 + $0x44] sm:$0xf]  ;;  %v328_v29 = vld [vmem:[#allocation5 + $0x48] sm:$0xf0]  ;;  %v383_v30 = vor.u32 %v413_v26, %v382_v21  ;;  %v408_v31 = vld [vmem:[#allocation5 + $0x94] sm:$0xf]  ;;  %v327_v37 = vor.u32 %v399_v24, %v326_v23 }
  0x16   :  { %247 = vmatpush.bf16.msra.mxu2 %v347_v12  ;;  %v368_v32 = vld [vmem:[#allocation5 + $0x98] sm:$0xf0]  ;;  %v374_v33 = vld [vmem:[#allocation5 + $0xa0] sm:$0xf]  ;;  %v411_v34 = vld [vmem:[#allocation5 + $0xa4] sm:$0xf0]  ;;  %v331_v42 = vor.u32 %v398_v28, %v328_v29 }
  0x17   :  { %237 = vmatpush.bf16.msra.mxu1 %v383_v30  ;;  %v318_v35 = vld [vmem:[#allocation5 + $0x30] sm:$0xf]  ;;  %v375_v36 = vor.u32 %v411_v34, %v374_v33  ;;  %v397_v38 = vld [vmem:[#allocation5 + $0x34] sm:$0xf0]  ;;  %v371_v39 = vor.u32 %v408_v31, %v368_v32  ;;  %v406_v40 = vld [vmem:[#allocation5 + $0x84] sm:$0xf] }
  0x18   :  { %v360_v41 = vld [vmem:[#allocation5 + $0x88] sm:$0xf0]  ;;  %v366_v43 = vld [vmem:[#allocation5 + $0x90] sm:$0xf]  ;;  %v409_v44 = vld [vmem:[#allocation5 + $0x94] sm:$0xf0]  ;;  %v319_v50 = vor.u32 %v397_v38, %v318_v35 }
  0x19   :  { %222 = vmatpush.bf16.msra.mxu0 %v335_v22  ;;  %264 = vmatpush.bf16.msra.mxu3 %v379_v25  ;;  %v59_v45 = vld [vmem:[#allocation2] sm:$0xff]  ;;  %v396_v46 = vld [vmem:[#allocation5 + $0x34] sm:$0xf]  ;;  %v367_v48 = vor.u32 %v409_v44, %v366_v43  ;;  %v363_v51 = vor.u32 %v406_v40, %v360_v41  ;;  %v358_v52 = vld [vmem:[#allocation5 + $0x80] sm:$0xf]  ;;  %vm216_vm0 = vcmask 523264  }
  0x1a   :  { %248 = vmatpush.bf16.msra.mxu2 %v339_v27  ;;  %v320_v47 = vld [vmem:[#allocation5 + $0x38] sm:$0xf0]  ;;  %v92_v49 = vunpack.c.h.b16 %v59_v45  ;;  %v407_v53 = vld [vmem:[#allocation5 + $0x84] sm:$0xf0]  ;;  %v310_v55 = vld [vmem:[#allocation5 + $0x20] sm:$0xf]  ;;  %v91_v9 = vunpack.c.l.b16 %v59_v45 }
  0x1b   :  { %238 = vmatpush.bf16.msra.mxu1 %v375_v36  ;;  %v323_v54 = vor.u32 %v396_v46, %v320_v47  ;;  %v395_v56 = vld [vmem:[#allocation5 + $0x24] sm:$0xf0]  ;;  %v394_v57 = vld [vmem:[#allocation5 + $0x24] sm:$0xf]  ;;  %v312_v58 = vld [vmem:[#allocation5 + $0x28] sm:$0xf0]  ;;  %v359_v60 = vor.u32 %v407_v53, %v358_v52 }
  0x1c   :  { %v94_v59 = vpack.c.b16 %v92_v49, %v92_v49  ;;  %v311_v61 = vor.u32 %v395_v56, %v310_v55  ;;  %v315_v62 = vor.u32 %v394_v57, %v312_v58  ;;  %v302_v63 = vld [vmem:[#allocation5 + $0x10] sm:$0xf]  ;;  %v393_v0 = vld [vmem:[#allocation5 + $0x14] sm:$0xf0]  ;;  %v392_v1 = vld [vmem:[#allocation5 + $0x14] sm:$0xf]  ;;  %v93_v12 = vpack.c.b16 %v91_v9, %v91_v9 }
  0x1d   :  { %223 = vmatpush.bf16.msra.mxu0 %v327_v37  ;;  %265 = vmatpush.bf16.msra.mxu3 %v371_v39  ;;  %v304_v2 = vld [vmem:[#allocation5 + $0x18] sm:$0xf0]  ;;  %v303_v3 = vor.u32 %v393_v0, %v302_v63  ;;  %v294_v5 = vld [vmem:[#allocation5] sm:$0xf]  ;;  %v391_v6 = vld [vmem:[#allocation5 + $0x4] sm:$0xf0] }
  0x1e   :  { %249 = vmatpush.bf16.msra.mxu2 %v331_v42  ;;  %v307_v4 = vor.u32 %v392_v1, %v304_v2  ;;  %v390_v7 = vld [vmem:[#allocation5 + $0x4] sm:$0xf]  ;;  %v296_v8 = vld [vmem:[#allocation5 + $0x8] sm:$0xf0]  ;;  %v295_v10 = vor.u32 %v391_v6, %v294_v5  ;;  %v84_v15 = vld [vmem:[#allocation7] sm:$0x3] }
  0x1f   :  { %239 = vmatpush.bf16.msra.mxu1 %v367_v48  ;;  %v299_v11 = vor.u32 %v390_v7, %v296_v8  ;;  %v86_v18 = vperm.slane %v84_v15, 0  ;;  %v87_v20 = vperm.slane %v84_v15, 1  ;;  %s527_s0 = smov [#allocation8]   ;;  %s281_s30 = sshll.u32 %s565_s3, 4  ;;  %s282_s30 = int_to_ptr.hbm [resolvable:$true] %s281_s30 }
  0x20   :  { %s279_s2 = sshll.u32 %s527_s0, 4  ;;  %s280_s2 = int_to_ptr.vmem [resolvable:$true] %s279_s2 }
  0x21   :  { %224 = vmatpush.bf16.msra.mxu0 %v319_v50  ;;  %266 = vmatpush.bf16.msra.mxu3 %v363_v51 }
  0x22   :  { %250 = vmatpush.bf16.msra.mxu2 %v323_v54 }
  0x23   :  { %240 = vmatpush.bf16.msra.mxu1 %v359_v60 }
  0x24   :  { %389 = vmatmul.msk.bf16.vlgmr.msra.gmra.mxu3 %vm216_vm0, %v94_v59 }
  0x25   :  { %225 = vmatpush.bf16.msra.mxu0 %v311_v61 }
  0x26   :  { %251 = vmatpush.bf16.msra.mxu2 %v315_v62  ;;  %388 = vmatmul.msk.bf16.vlgmr.msra.gmra.mxu1 %vm216_vm0, %v94_v59 }
  0x29   :  { %226 = vmatpush.bf16.msra.mxu0 %v303_v3 }
  0x2a   :  { %252 = vmatpush.bf16.msra.mxu2 %v307_v4 }
  0x2d   :  { %227 = vmatpush.bf16.msra.mxu0 %v295_v10 }
  0x2e   :  { %253 = vmatpush.bf16.msra.mxu2 %v299_v11 }
  0x30   :  { %228 = vmatmul.bf16.vlgmr.msra.gmra.mxu0 %v93_v12 }
  0x31   :  { %254 = vmatmul.bf16.vlgmr.msra.gmra.mxu2 %v93_v12 }
  0xa3   :  { %v242_v13 = vpop.f32.mrf.mxu1 }
  0xa7   :  { %v268_v14 = vpop.f32.mrf.mxu3 }
  0xab   :  { %v244_v16 = vpop.f32.mrf.mxu1 }
  0xad   :  { %v229_v17 = vpop.f32.mrf.mxu0 }
  0xae   :  { %v230_v21 = vadd.f32 %v229_v17, %v86_v18 }
  0xaf   :  { %v270_v19 = vpop.f32.mrf.mxu3 }
  0xb0   :  { %v243_v25 = vadd.f32 %v242_v13, %v230_v21 }
  0xb4   :  { %v255_v22 = vpop.f32.mrf.mxu2 }
  0xb5   :  { %v256_v23 = vadd.f32 %v255_v22, %v87_v20  ;;  %v231_v24 = vpop.f32.mrf.mxu0 }
  0xb7   :  { %v269_v26 = vadd.f32 %v268_v14, %v256_v23 }
  0xb9   :  { %v272_v27 = vpack.c.bf16 %v269_v26, %v243_v25 }
  0xbb   :  { %273 = vst [vmem:[#allocation8] sm:$0xff] %v272_v27 }
  0xbc   :  { %v257_v28 = vpop.f32.mrf.mxu2  ;;  %284 = dma.vmem_to_hbm [thread:$0]  %s280_s2, 128, %s282_s30, [#allocation4]  }
  0xbd   :  { %520 = dma.done.wait [#allocation4], 128  }
  0xbe   :  { %521 = vsyncadd [#allocation4], 4294967168 }
  0xbf   :  { %289 = vsyncpa [#allocation3], 1 }
  0xc0   :  { %290 = vsyncpa [#allocation6], 1 }
  0xc1   :  { %291 = vsyncpa [#allocation4], 1 }

</bundles_post_ra>
